<compile_context>
chip_gen: v7x
topology: tpu7x:2x2x1
jax: 0.10.0
libtpu: 0.0.40
codegen_flags: <defaults>
</compile_context>

<pallas_src>
import jax
import jax.numpy as jnp
from jax.experimental import pallas as pl
from jax.experimental.pallas import tpu as pltpu


def _vib_encoder_kernel(
    x_ref,      # (TB, D)   f32 or bf16
    w1_ref,     # (D, H)
    b1_ref,     # (1, H)    f32
    w2_ref,     # (H, H)
    b2_ref,     # (1, H)    f32
    wmu_ref,    # (H, E)
    bmu_ref,    # (1, E)    f32
    wls_ref,    # (H, E)
    bls_ref,    # (1, E)    f32
    mu_ref,     # (TB, E)   f32 out
    ls_ref,     # (TB, E)   f32 out
):
    # MXU inputs may be bf16 (default, fast path on every generation);
    # accumulation and all elementwise / transcendental work stays in f32.
    h = jnp.dot(x_ref[...], w1_ref[...], preferred_element_type=jnp.float32)
    h = jnp.maximum(h + b1_ref[...], 0.0)

    h = jnp.dot(h.astype(w2_ref.dtype), w2_ref[...],
                preferred_element_type=jnp.float32)
    h = jnp.maximum(h + b2_ref[...], 0.0)
    h = h.astype(wmu_ref.dtype)

    # mu head: plain affine.
    mu = jnp.dot(h, wmu_ref[...], preferred_element_type=jnp.float32) + bmu_ref[...]
    mu_ref[...] = mu.astype(mu_ref.dtype)

    # log-sigma head: 2 * log(softplus(z - 5)), softplus via logaddexp(z, 0).
    # Computed only on the E-wide half (halves EUP pushes vs a fused 2E head).
    # Matches the PyTorch reference exactly, including -inf when softplus
    # underflows for very negative pre-activations.
    z = jnp.dot(h, wls_ref[...], preferred_element_type=jnp.float32) + bls_ref[...] - 5.0
    ls_ref[...] = (2.0 * jnp.log(jnp.logaddexp(z, 0.0))).astype(ls_ref.dtype)


def _pick_batch_tile(b):
    """Pick a large, MXU/stream-friendly batch tile.

    Prefers tiles giving an even grid (both v7x TensorCores busy), then any
    grid >= 2; small batches run as a single full-extent block.
    """
    candidates = (4096, 2048, 1024, 512, 256, 128)
    for tb in candidates:
        if b > tb and pl.cdiv(b, tb) % 2 == 0:
            return tb
    for tb in candidates:
        if b > tb:
            return tb
    return b  # single block covering the whole (small) batch


def vib_encoder_forward(x, params, *, batch_tile=None, matmul_dtype=jnp.bfloat16):
    """VIB encoder forward with one Pallas TPU kernel.

    x           : (B, dim_data)
    params      : dict with w1,b1,w2,b2,w_mu,b_mu,w_ls,b_ls in (in, out) layout
    batch_tile  : optional explicit batch tile (rows per grid step)
    matmul_dtype: dtype for MXU inputs (default bf16 on all generations);
                  accumulation + epilogue always stay f32. Pass jnp.float32
                  for exact-f32 matmuls.
    returns     : (mu, log_sigma), each (B, dim_embedding) float32
    """
    B, D = x.shape
    H = params["w1"].shape[1]
    E = params["w_mu"].shape[1]

    w1, w2, w_mu, w_ls = params["w1"], params["w2"], params["w_mu"], params["w_ls"]
    b1 = params["b1"].astype(jnp.float32)
    b2 = params["b2"].astype(jnp.float32)
    b_mu = params["b_mu"].astype(jnp.float32)
    b_ls = params["b_ls"].astype(jnp.float32)
    if matmul_dtype is not None:
        x = x.astype(matmul_dtype)
        w1 = w1.astype(matmul_dtype)
        w2 = w2.astype(matmul_dtype)
        w_mu = w_mu.astype(matmul_dtype)
        w_ls = w_ls.astype(matmul_dtype)

    # No jnp.pad / no post-kernel slices: grid covers B with cdiv and Pallas
    # masks the ragged final block (reads are per-row independent, stores are
    # masked to the valid rows).
    TB = batch_tile or _pick_batch_tile(B)
    grid = (pl.cdiv(B, TB),)

    # Constant weights/biases: block index never changes so they are DMA'd once.
    full = lambda shape: pl.BlockSpec(shape, lambda i: (0, 0))

    grid_spec = pltpu.PrefetchScalarGridSpec(
        num_scalar_prefetch=0,
        grid=grid,
        in_specs=[
            pl.BlockSpec((TB, D), lambda i: (i, 0)),   # x
            full((D, H)),                              # w1
            full((1, H)),                              # b1
            full((H, H)),                              # w2
            full((1, H)),                              # b2
            full((H, E)),                              # w_mu
            full((1, E)),                              # b_mu
            full((H, E)),                              # w_ls
            full((1, E)),                              # b_ls
        ],
        out_specs=[
            pl.BlockSpec((TB, E), lambda i: (i, 0)),   # mu
            pl.BlockSpec((TB, E), lambda i: (i, 0)),   # log_sigma
        ],
    )

    def nbytes(a):
        return a.size * a.dtype.itemsize

    cost = pl.CostEstimate(
        flops=2 * B * (D * H + H * H + 2 * H * E),
        transcendentals=3 * B * E,
        bytes_accessed=(nbytes(x)
                        + nbytes(w1) + nbytes(w2) + nbytes(w_mu) + nbytes(w_ls)
                        + nbytes(b1) + nbytes(b2) + nbytes(b_mu) + nbytes(b_ls)
                        + 2 * B * E * 4),
    )

    mu, log_sigma = pl.pallas_call(
        _vib_encoder_kernel,
        out_shape=(jax.ShapeDtypeStruct((B, E), jnp.float32),
                   jax.ShapeDtypeStruct((B, E), jnp.float32)),
        grid_spec=grid_spec,
        compiler_params=pltpu.CompilerParams(
            dimension_semantics=("parallel",),
        ),
        cost_estimate=cost,
    )(x, w1, b1, w2, b2, w_mu, b_mu, w_ls, b_ls)

    return mu, log_sigma


def _xavier_uniform(key, fan_in, fan_out):
    # torch.nn.init.xavier_uniform_: U(-a, a), a = sqrt(6/(fan_in+fan_out)).
    # We store (in, out) = transpose of torch's (out, in); same distribution.
    bound = jnp.sqrt(6.0 / (fan_in + fan_out))
    return jax.random.uniform(
        key, (fan_in, fan_out), dtype=jnp.float32, minval=-bound, maxval=bound
    )


def init_vib_encoder_params(key, dim_data, dim_embedding, dim_hidden):
    k1, k2, k3, k4 = jax.random.split(key, 4)
    return {
        "w1": _xavier_uniform(k1, dim_data, dim_hidden),
        "b1": jnp.zeros((1, dim_hidden), jnp.float32),
        "w2": _xavier_uniform(k2, dim_hidden, dim_hidden),
        "b2": jnp.zeros((1, dim_hidden), jnp.float32),
        "w_mu": _xavier_uniform(k3, dim_hidden, dim_embedding),
        "b_mu": jnp.zeros((1, dim_embedding), jnp.float32),
        "w_ls": _xavier_uniform(k4, dim_hidden, dim_embedding),
        "b_ls": jnp.zeros((1, dim_embedding), jnp.float32),
    }


def _reference_forward(x, p):
    # Pure-JAX reference matching the PyTorch forward.
    h = jax.nn.relu(x @ p["w1"] + p["b1"])
    h = jax.nn.relu(h @ p["w2"] + p["b2"])
    mu = h @ p["w_mu"] + p["b_mu"]
    log_sigma = 2.0 * jnp.log(jax.nn.softplus(h @ p["w_ls"] + p["b_ls"] - 5.0))
    return mu, log_sigma


if __name__ == "__main__":
    # Small shapes consistent with the module: dim_data=32, hidden=64, embedding=16.
    B, dim_data, dim_hidden, dim_embedding = 8, 32, 64, 16

    key = jax.random.PRNGKey(0)
    k_x, k_p = jax.random.split(key)
    x = jax.random.normal(k_x, (B, dim_data), dtype=jnp.float32)
    params = init_vib_encoder_params(k_p, dim_data, dim_embedding, dim_hidden)

    mu_ref, ls_ref = _reference_forward(x, params)

    # Default path (bf16 MXU inputs, f32 accumulation + f32 epilogue).
    mu, log_sigma = vib_encoder_forward(x, params)
    jax.block_until_ready((mu, log_sigma))
    assert mu.shape == (B, dim_embedding) and log_sigma.shape == (B, dim_embedding)
    assert jnp.allclose(mu, mu_ref, atol=0.25, rtol=0.05)
    assert jnp.allclose(log_sigma, ls_ref, atol=0.25, rtol=0.05)

    # Exact-f32 matmul path: tight tolerance.
    mu32, ls32 = vib_encoder_forward(x, params, matmul_dtype=jnp.float32)
    jax.block_until_ready((mu32, ls32))
    assert jnp.allclose(mu32, mu_ref, atol=1e-4, rtol=1e-4)
    assert jnp.allclose(ls32, ls_ref, atol=1e-4, rtol=1e-4)

    # Ragged batch: grid > 1 with a partial final block (no jnp.pad, no output
    # slice copies — Pallas masks the out-of-bounds rows).
    B2 = 272
    x2 = jax.random.normal(jax.random.PRNGKey(1), (B2, dim_data), dtype=jnp.float32)
    mu2, ls2 = vib_encoder_forward(x2, params, batch_tile=128,
                                   matmul_dtype=jnp.float32)
    jax.block_until_ready((mu2, ls2))
    mu2_ref, ls2_ref = _reference_forward(x2, params)
    assert mu2.shape == (B2, dim_embedding) and ls2.shape == (B2, dim_embedding)
    assert jnp.allclose(mu2, mu2_ref, atol=1e-4, rtol=1e-4)
    assert jnp.allclose(ls2, ls2_ref, atol=1e-4, rtol=1e-4)

    # Auto tile selection on a larger batch (exercises _pick_batch_tile + bf16 default).
    B3 = 1024
    x3 = jax.random.normal(jax.random.PRNGKey(2), (B3, dim_data), dtype=jnp.float32)
    mu3, ls3 = vib_encoder_forward(x3, params)
    jax.block_until_ready((mu3, ls3))
    mu3_ref, ls3_ref = _reference_forward(x3, params)
    assert jnp.allclose(mu3, mu3_ref, atol=0.25, rtol=0.05)
    assert jnp.allclose(ls3, ls3_ref, atol=0.25, rtol=0.05)

    print("KERNEL_OK")
</pallas_src>

<mosaic_0001>
module attributes {stable_mosaic.version = 11 : i64} {
  func.func @_vib_encoder_kernel(%arg0: i32, %arg1: memref<8x32xbf16, #tpu.memory_space<vmem>>, %arg2: memref<32x64xbf16, #tpu.memory_space<vmem>>, %arg3: memref<1x64xf32, #tpu.memory_space<vmem>>, %arg4: memref<64x64xbf16, #tpu.memory_space<vmem>>, %arg5: memref<1x64xf32, #tpu.memory_space<vmem>>, %arg6: memref<64x16xbf16, #tpu.memory_space<vmem>>, %arg7: memref<1x16xf32, #tpu.memory_space<vmem>>, %arg8: memref<64x16xbf16, #tpu.memory_space<vmem>>, %arg9: memref<1x16xf32, #tpu.memory_space<vmem>>, %arg10: memref<8x16xf32, #tpu.memory_space<vmem>>, %arg11: memref<8x16xf32, #tpu.memory_space<vmem>>) attributes {dimension_semantics = [#tpu.dimension_semantics<parallel>], iteration_bounds = array<i64: 1>, scalar_prefetch = 0 : i64, scratch_operands = 0 : i64, tpu.core_type = #tpu.core_type<tc>, window_params = [{transform_indices = @transform_0, window_bounds = array<i64: 8, 32>}, {pipeline_mode = #tpu.pipeline_mode<synchronous>, transform_indices = @transform_1, window_bounds = array<i64: 32, 64>}, {pipeline_mode = #tpu.pipeline_mode<synchronous>, transform_indices = @transform_2, window_bounds = array<i64: 1, 64>}, {pipeline_mode = #tpu.pipeline_mode<synchronous>, transform_indices = @transform_3, window_bounds = array<i64: 64, 64>}, {pipeline_mode = #tpu.pipeline_mode<synchronous>, transform_indices = @transform_4, window_bounds = array<i64: 1, 64>}, {pipeline_mode = #tpu.pipeline_mode<synchronous>, transform_indices = @transform_5, window_bounds = array<i64: 64, 16>}, {pipeline_mode = #tpu.pipeline_mode<synchronous>, transform_indices = @transform_6, window_bounds = array<i64: 1, 16>}, {pipeline_mode = #tpu.pipeline_mode<synchronous>, transform_indices = @transform_7, window_bounds = array<i64: 64, 16>}, {pipeline_mode = #tpu.pipeline_mode<synchronous>, transform_indices = @transform_8, window_bounds = array<i64: 1, 16>}, {transform_indices = @transform_9, window_bounds = array<i64: 8, 16>}, {transform_indices = @transform_10, window_bounds = array<i64: 8, 16>}]} {
    %c0 = arith.constant 0 : index
    %c0_0 = arith.constant 0 : index
    %0 = vector.load %arg1[%c0, %c0_0] : memref<8x32xbf16, #tpu.memory_space<vmem>>, vector<8x32xbf16>
    %c0_1 = arith.constant 0 : index
    %c0_2 = arith.constant 0 : index
    %1 = vector.load %arg2[%c0_1, %c0_2] : memref<32x64xbf16, #tpu.memory_space<vmem>>, vector<32x64xbf16>
    %cst = arith.constant dense<0.000000e+00> : vector<8x64xf32>
    %2 = tpu.matmul %0, %1, %cst {dimension_numbers = #tpu.dot_dimension_numbers<[1], [0], [0], [1], [0, 0, 1, 1], [], []>} : vector<8x32xbf16>, vector<32x64xbf16>, vector<8x64xf32> -> vector<8x64xf32>
    %c0_3 = arith.constant 0 : index
    %c0_4 = arith.constant 0 : index
    %3 = vector.load %arg3[%c0_3, %c0_4] : memref<1x64xf32, #tpu.memory_space<vmem>>, vector<1x64xf32>
    %4 = vector.broadcast %3 : vector<1x64xf32> to vector<8x64xf32>
    %5 = arith.addf %2, %4 : vector<8x64xf32>
    %cst_5 = arith.constant 0.000000e+00 : f32
    %6 = vector.broadcast %cst_5 : f32 to vector<8x64xf32>
    %7 = arith.maximumf %5, %6 : vector<8x64xf32>
    %8 = arith.truncf %7 : vector<8x64xf32> to vector<8x64xbf16>
    %c0_6 = arith.constant 0 : index
    %c0_7 = arith.constant 0 : index
    %9 = vector.load %arg4[%c0_6, %c0_7] : memref<64x64xbf16, #tpu.memory_space<vmem>>, vector<64x64xbf16>
    %cst_8 = arith.constant dense<0.000000e+00> : vector<8x64xf32>
    %10 = tpu.matmul %8, %9, %cst_8 {dimension_numbers = #tpu.dot_dimension_numbers<[1], [0], [0], [1], [0, 0, 1, 1], [], []>} : vector<8x64xbf16>, vector<64x64xbf16>, vector<8x64xf32> -> vector<8x64xf32>
    %c0_9 = arith.constant 0 : index
    %c0_10 = arith.constant 0 : index
    %11 = vector.load %arg5[%c0_9, %c0_10] : memref<1x64xf32, #tpu.memory_space<vmem>>, vector<1x64xf32>
    %12 = vector.broadcast %11 : vector<1x64xf32> to vector<8x64xf32>
    %13 = arith.addf %10, %12 : vector<8x64xf32>
    %cst_11 = arith.constant 0.000000e+00 : f32
    %14 = vector.broadcast %cst_11 : f32 to vector<8x64xf32>
    %15 = arith.maximumf %13, %14 : vector<8x64xf32>
    %16 = arith.truncf %15 : vector<8x64xf32> to vector<8x64xbf16>
    %c0_12 = arith.constant 0 : index
    %c0_13 = arith.constant 0 : index
    %17 = vector.load %arg6[%c0_12, %c0_13] : memref<64x16xbf16, #tpu.memory_space<vmem>>, vector<64x16xbf16>
    %cst_14 = arith.constant dense<0.000000e+00> : vector<8x16xf32>
    %18 = tpu.matmul %16, %17, %cst_14 {dimension_numbers = #tpu.dot_dimension_numbers<[1], [0], [0], [1], [0, 0, 1, 1], [], []>} : vector<8x64xbf16>, vector<64x16xbf16>, vector<8x16xf32> -> vector<8x16xf32>
    %c0_15 = arith.constant 0 : index
    %c0_16 = arith.constant 0 : index
    %19 = vector.load %arg7[%c0_15, %c0_16] : memref<1x16xf32, #tpu.memory_space<vmem>>, vector<1x16xf32>
    %20 = vector.broadcast %19 : vector<1x16xf32> to vector<8x16xf32>
    %21 = arith.addf %18, %20 : vector<8x16xf32>
    %c0_17 = arith.constant 0 : index
    %c0_18 = arith.constant 0 : index
    %22 = vector.load %arg10[%c0_17, %c0_18] : memref<8x16xf32, #tpu.memory_space<vmem>>, vector<8x16xf32>
    tpu.vector_store %arg10[%c0_17, %c0_18], %21 {strides = array<i32>} : memref<8x16xf32, #tpu.memory_space<vmem>>, vector<8x16xf32>,
    %c0_19 = arith.constant 0 : index
    %c0_20 = arith.constant 0 : index
    %23 = vector.load %arg8[%c0_19, %c0_20] : memref<64x16xbf16, #tpu.memory_space<vmem>>, vector<64x16xbf16>
    %cst_21 = arith.constant dense<0.000000e+00> : vector<8x16xf32>
    %24 = tpu.matmul %16, %23, %cst_21 {dimension_numbers = #tpu.dot_dimension_numbers<[1], [0], [0], [1], [0, 0, 1, 1], [], []>} : vector<8x64xbf16>, vector<64x16xbf16>, vector<8x16xf32> -> vector<8x16xf32>
    %c0_22 = arith.constant 0 : index
    %c0_23 = arith.constant 0 : index
    %25 = vector.load %arg9[%c0_22, %c0_23] : memref<1x16xf32, #tpu.memory_space<vmem>>, vector<1x16xf32>
    %26 = vector.broadcast %25 : vector<1x16xf32> to vector<8x16xf32>
    %27 = arith.addf %24, %26 : vector<8x16xf32>
    %cst_24 = arith.constant 5.000000e+00 : f32
    %28 = vector.broadcast %cst_24 : f32 to vector<8x16xf32>
    %29 = arith.subf %27, %28 : vector<8x16xf32>
    %cst_25 = arith.constant 0.000000e+00 : f32
    %30 = vector.broadcast %cst_25 : f32 to vector<8x16xf32>
    %31 = arith.maximumf %29, %30 : vector<8x16xf32>
    %32 = vector.broadcast %cst_25 : f32 to vector<8x16xf32>
    %33 = arith.subf %29, %32 : vector<8x16xf32>
    %34 = arith.cmpf one, %33, %33 : vector<8x16xf32>
    %35 = vector.broadcast %cst_25 : f32 to vector<8x16xf32>
    %36 = arith.addf %29, %35 : vector<8x16xf32>
    %37 = math.absf %33 : vector<8x16xf32>
    %cst_26 = arith.constant 0.000000e+00 : f32
    %38 = vector.broadcast %cst_26 : f32 to vector<8x16xf32>
    %39 = arith.subf %38, %37 : vector<8x16xf32>
    %40 = math.exp %39 : vector<8x16xf32>
    %41 = math.log1p %40 : vector<8x16xf32>
    %42 = arith.addf %31, %41 : vector<8x16xf32>
    %43 = arith.select %34, %36, %42 : vector<8x16xi1>, vector<8x16xf32>
    %44 = math.log %43 : vector<8x16xf32>
    %cst_27 = arith.constant 2.000000e+00 : f32
    %45 = vector.broadcast %cst_27 : f32 to vector<8x16xf32>
    %46 = arith.mulf %45, %44 : vector<8x16xf32>
    %c0_28 = arith.constant 0 : index
    %c0_29 = arith.constant 0 : index
    %47 = vector.load %arg11[%c0_28, %c0_29] : memref<8x16xf32, #tpu.memory_space<vmem>>, vector<8x16xf32>
    tpu.vector_store %arg11[%c0_28, %c0_29], %46 {strides = array<i32>} : memref<8x16xf32, #tpu.memory_space<vmem>>, vector<8x16xf32>,
    return
  }
  func.func @transform_0(%arg0: i32) -> (i32, i32) {
    %c0_i32 = arith.constant 0 : i32
    %c0_i32_0 = arith.constant 0 : i32
    return %arg0, %c0_i32 : i32, i32
  }
  func.func @transform_1(%arg0: i32) -> (i32, i32) {
    %c0_i32 = arith.constant 0 : i32
    %c0_i32_0 = arith.constant 0 : i32
    %c0_i32_1 = arith.constant 0 : i32
    return %c0_i32, %c0_i32_0 : i32, i32
  }
  func.func @transform_2(%arg0: i32) -> (i32, i32) {
    %c0_i32 = arith.constant 0 : i32
    %c0_i32_0 = arith.constant 0 : i32
    %c0_i32_1 = arith.constant 0 : i32
    return %c0_i32, %c0_i32_0 : i32, i32
  }
  func.func @transform_3(%arg0: i32) -> (i32, i32) {
    %c0_i32 = arith.constant 0 : i32
    %c0_i32_0 = arith.constant 0 : i32
    %c0_i32_1 = arith.constant 0 : i32
    return %c0_i32, %c0_i32_0 : i32, i32
  }
  func.func @transform_4(%arg0: i32) -> (i32, i32) {
    %c0_i32 = arith.constant 0 : i32
    %c0_i32_0 = arith.constant 0 : i32
    %c0_i32_1 = arith.constant 0 : i32
    return %c0_i32, %c0_i32_0 : i32, i32
  }
  func.func @transform_5(%arg0: i32) -> (i32, i32) {
    %c0_i32 = arith.constant 0 : i32
    %c0_i32_0 = arith.constant 0 : i32
    %c0_i32_1 = arith.constant 0 : i32
    return %c0_i32, %c0_i32_0 : i32, i32
  }
  func.func @transform_6(%arg0: i32) -> (i32, i32) {
    %c0_i32 = arith.constant 0 : i32
    %c0_i32_0 = arith.constant 0 : i32
    %c0_i32_1 = arith.constant 0 : i32
    return %c0_i32, %c0_i32_0 : i32, i32
  }
  func.func @transform_7(%arg0: i32) -> (i32, i32) {
    %c0_i32 = arith.constant 0 : i32
    %c0_i32_0 = arith.constant 0 : i32
    %c0_i32_1 = arith.constant 0 : i32
    return %c0_i32, %c0_i32_0 : i32, i32
  }
  func.func @transform_8(%arg0: i32) -> (i32, i32) {
    %c0_i32 = arith.constant 0 : i32
    %c0_i32_0 = arith.constant 0 : i32
    %c0_i32_1 = arith.constant 0 : i32
    return %c0_i32, %c0_i32_0 : i32, i32
  }
  func.func @transform_9(%arg0: i32) -> (i32, i32) {
    %c0_i32 = arith.constant 0 : i32
    %c0_i32_0 = arith.constant 0 : i32
    return %arg0, %c0_i32 : i32, i32
  }
  func.func @transform_10(%arg0: i32) -> (i32, i32) {
    %c0_i32 = arith.constant 0 : i32
    %c0_i32_0 = arith.constant 0 : i32
    return %arg0, %c0_i32 : i32, i32
  }
}

</mosaic_0001>

<bundles_post_ra>
// kernel: tpu_custom_call.1
= control target key start
LH: loop header
LB: loop body
LE: loop exit
PB: predicated region body
PF: predicated region fallthrough
CT: control target
= control target key end

     0   :  { %16 = vsyncpa [#allocation3], 0  ;;  %v563_v1 = vmov 0.0   ;;  %vm564_vm0 = vmmov 0   ;;  %vm61_vm1 = vcmask 261120   ;;  %s712_s0 = inlined_call_operand.vmem [shape: bf16[8,32], index: 0, kind: input, shape index: {}]   ;;  %s713_s1 = inlined_call_operand.vmem [shape: bf16[32,64], index: 1, kind: input, shape index: {}]   ;;  %s714_s2 = inlined_call_operand.vmem [shape: f32[1,64], index: 2, kind: input, shape index: {}]   ;;  %s715_s3 = inlined_call_operand.vmem [shape: bf16[64,64], index: 3, kind: input, shape index: {}]   ;;  %s716_s4 = inlined_call_operand.vmem [shape: f32[1,64], index: 4, kind: input, shape index: {}]   ;;  %s717_s5 = inlined_call_operand.vmem [shape: bf16[64,16], index: 5, kind: input, shape index: {}]   ;;  %s718_s6 = inlined_call_operand.vmem [shape: f32[1,16], index: 6, kind: input, shape index: {}]   ;;  %s719_s7 = inlined_call_operand.vmem [shape: bf16[64,16], index: 7, kind: input, shape index: {}]   ;;  %s720_s8 = inlined_call_operand.vmem [shape: f32[1,16], index: 8, kind: input, shape index: {}]   ;;  %s721_s9 = inlined_call_operand.hbm [shape: f32[8,16], index: 9, kind: output, shape index: {0}]   ;;  %s722_s10 = inlined_call_operand.hbm [shape: f32[8,16], index: 10, kind: output, shape index: {1}]  }
   0x1   :  { %v495_v0 = vld [vmem:[%s713_s1] sm:$0xff]   ;;  %447 = vmatprep.subr.bf16.mxu0 %v563_v1  ;;  %455 = vmatprep.subr.bf16.mxu1 %v563_v1  ;;  %v496_v2 = vld [vmem:[%s713_s1 + $0x8] sm:$0xff]  }
   0x2   :  { %448 = vmatpush3.bf16.msra.mxu0 %v495_v0  ;;  %451 = vmatprep.mubr.msk.bf16.mxu0 %vm564_vm0, %v563_v1  ;;  %v497_v3 = vld [vmem:[%s715_s3] sm:$0xff]   ;;  %v498_v5 = vld [vmem:[%s715_s3 + $0x8] sm:$0xff]  }
   0x3   :  { %449 = vmatprep.subr.bf16.mxu0 %v563_v1  ;;  %463 = vmatprep.mubr.msk.bf16.mxu1 %vm564_vm0, %v563_v1  ;;  %v37_v4 = vld [vmem:[%s712_s0] sm:$0xf] }
   0x4   :  { %456 = vmatpush3.bf16.msra.mxu1 %v497_v3 }
   0x5   :  { %457 = vmatprep.subr.bf16.mxu1 %v563_v1 }
   0x6   :  { %450 = vmatpush3.bf16.msra.mxu0 %v496_v2 }
   0x7   :  { %467 = vmatprep.subr.bf16.mxu0 %v563_v1 }
   0x8   :  { %458 = vmatpush3.bf16.msra.mxu1 %v498_v5 }
   0x9   :  { %452 = vmatmul.mubr.msk.bf16.vlgmr.msra.gmra.mrb[0].mxu0 %vm61_vm1, %v37_v4  ;;  %459 = vmatprep.subr.bf16.mxu1 %v563_v1 }
   0xa   :  { %475 = vmatprep.mubr.msk.bf16.mxu0 %vm564_vm0, %v563_v1 }
   0xb   :  { %17 = vsyncpa [#allocation5], 0  ;;  %v499_v6 = vld [vmem:[%s715_s3 + $0x10] sm:$0xff]   ;;  %v500_v7 = vld [vmem:[%s715_s3 + $0x18] sm:$0xff]   ;;  %vm146_vm2 = vcmask 523264   ;;  %vm274_vm3 = vcmask 130048  }
   0xc   :  { %460 = vmatpush3.bf16.msra.mxu1 %v499_v6  ;;  %v501_v8 = vld [vmem:[%s717_s5] sm:$0xff]   ;;  %v503_v9 = vld [vmem:[%s717_s5 + $0x8] sm:$0xff]   ;;  %v505_v20 = vld [vmem:[%s717_s5 + $0x10] sm:$0xff]  }
   0xd   :  { %461 = vmatprep.subr.bf16.mxu1 %v563_v1  ;;  %468 = vmatpush3.bf16.msra.mxu0 %v501_v8  ;;  %v406_v10 = vld [vmem:[%s714_s2] ss:$0 sm:$0xff]  ;;  %v504_v19 = vld [vmem:[%s719_s7 + $0x8] sm:$0xff]   ;;  %v506_v21 = vld [vmem:[%s719_s7 + $0x10] sm:$0xff]  }
   0xe   :  { %469 = vmatprep.subr.bf16.mxu0 %v563_v1  ;;  %v502_v17 = vld [vmem:[%s719_s7] sm:$0xff]   ;;  %v507_v22 = vld [vmem:[%s717_s5 + $0x18] sm:$0xff]  }
   0xf   :  { %v508_v23 = vld [vmem:[%s719_s7 + $0x18] sm:$0xff]   ;;  %v410_v24 = vld [vmem:[%s716_s4] ss:$0 sm:$0xff]  ;;  %s565_s4 = smov [#allocation2]  }
  0x10   :  { %462 = vmatpush3.bf16.msra.mxu1 %v500_v7  ;;  %v416_v32 = vld [vmem:[%s718_s6] ss:$0 sm:$0xff]  ;;  %s384_s0 = sshll.u32 %s565_s4, 4  ;;  %s385_s0 = int_to_ptr.vmem [resolvable:$true] %s384_s0 }
  0x11   :  { %479 = vmatprep.subr.bf16.mxu1 %v563_v1  ;;  %470 = vmatpush3.bf16.msra.mxu0 %v503_v9  ;;  %v422_v33 = vld [vmem:[%s720_s8] ss:$0 sm:$0xff]  ;;  %s515_s6 = scalar_lea.vmem %s385_s0, 128  ;;  %p520_p1 = scmp.lt.s32.totalorder %s385_s0, %s385_s0 }
  0x12   :  { %471 = vmatprep.subr.bf16.mxu0 %v563_v1  ;;  %p516_p0 = scmp.ne.s32.totalorder %s385_s0, %s515_s6  ;;  %p521_p2 = scmp.lt.s32.totalorder %s515_s6, %s515_s6 }
  0x14   :  { %p522_p3 = por %p521_p2, %p520_p1 }
  0x15   :  { %472 = vmatpush3.bf16.msra.mxu0 %v505_v20 }
  0x16   :  { %473 = vmatprep.subr.bf16.mxu0 %v563_v1  ;;  %p523_p4 = pnand %p522_p3, %p516_p0 }
  0x19   :  { %474 = vmatpush3.bf16.msra.mxu0 %v507_v22 }
  0xdc   :  { %v99_v11 = vpop.f32.mrb[0].mxu0 }
  0xdd   :  { %v100_v12 = vadd.f32 %v406_v10, %v99_v11  ;;  %v453_v13 = vpop.f32.mrb[1].mxu0 }
  0xde   :  { %v102_v14 = vpop.f32.mrb[2].mxu0 }
  0xdf   :  { %v105_v15 = vmax.f32 %v100_v12, 0.0  ;;  %v454_v16 = vpop.f32.mrb[3].mxu0 }
  0xe1   :  { %v106_v18 = vpack.c.bf16 %v105_v15, %v105_v15 }
  0xe3   :  { %464 = vmatmul.mubr.msk.bf16.vlgmr.msra.gmra.mrb[0].mxu1 %vm146_vm2, %v106_v18 }
  0xe4   :  { %480 = vmatpush3.bf16.msra.mxu1 %v502_v17  ;;  %487 = vmatprep.mubr.msk.bf16.mxu1 %vm564_vm0, %v563_v1 }
  0xe5   :  { %481 = vmatprep.subr.bf16.mxu1 %v563_v1 }
  0xe8   :  { %482 = vmatpush3.bf16.msra.mxu1 %v504_v19 }
  0xe9   :  { %483 = vmatprep.subr.bf16.mxu1 %v563_v1 }
  0xec   :  { %484 = vmatpush3.bf16.msra.mxu1 %v506_v21 }
  0xed   :  { %485 = vmatprep.subr.bf16.mxu1 %v563_v1 }
  0xf0   :  { %486 = vmatpush3.bf16.msra.mxu1 %v508_v23 }
 0x1b6   :  { %v184_v25 = vpop.f32.mrb[0].mxu1 }
 0x1b7   :  { %v185_v26 = vadd.f32 %v410_v24, %v184_v25  ;;  %v465_v27 = vpop.f32.mrb[1].mxu1 }
 0x1b8   :  { %v187_v28 = vpop.f32.mrb[2].mxu1 }
 0x1b9   :  { %v190_v29 = vmax.f32 %v185_v26, 0.0  ;;  %v466_v30 = vpop.f32.mrb[3].mxu1 }
 0x1bb   :  { %v191_v31 = vpack.c.bf16 %v190_v29, %v190_v29 }
 0x1bd   :  { %476 = vmatmul.mubr.msk.bf16.vlgmr.msra.gmra.mrb[4].mxu0 %vm146_vm2, %v191_v31  ;;  %488 = vmatmul.mubr.msk.bf16.vlgmr.msra.gmra.mrb[4].mxu1 %vm146_vm2, %v191_v31 }
 0x290   :  { %v268_v34 = vpop.f32.mrb[4].mxu0  ;;  %v349_v35 = vpop.f32.mrb[4].mxu1 }
 0x291   :  { %v269_v36 = vadd.f32 %v416_v32, %v268_v34  ;;  %v350_v37 = vadd.f32 %v422_v33, %v349_v35  ;;  %v477_v38 = vpop.f32.mrb[5].mxu0  ;;  %v489_v39 = vpop.f32.mrb[5].mxu1 }
 0x292   :  { %v271_v40 = vpop.f32.mrb[6].mxu0  ;;  %v352_v41 = vpop.f32.mrb[6].mxu1 }
 0x293   :  { %v428_v42 = vadd.f32 -5.0, %v350_v37  ;;  %v478_v43 = vpop.f32.mrb[7].mxu0  ;;  %v490_v44 = vpop.f32.mrb[7].mxu1  ;;  %275 = vst.msk [vmem:[#allocation2] sm:$0xff] %vm274_vm3, %v269_v36 }
 0x294   :  { %526 = shalt.err (!%p523_p4)
}
 0x295   :  { %s527_s25 = scalar_lea.hbm %s721_s9, 128 }
 0x296   :  { %p528_p5 = scmp.ne.s32.totalorder %s721_s9, %s527_s25  ;;  %p531_p6 = scmp.lt.u32.totalorder %s527_s25, %s721_s9 }
 0x298   :  { %p533_p7 = pnand %p531_p6, %p528_p5 }
 0x29a   :  { %536 = shalt.err (!%p533_p7)
}
 0x29b   :  { %387 = dma.vmem_to_hbm [thread:$0]  %s385_s0, 128, %s721_s9, [#allocation3]   ;;  %v359_v45 = vand.u32 2147483647, %v428_v42  ;;  %v356_v56 = vmax.f32 %v428_v42, 0.0  ;;  %vm357_vm5 = vcmp.ne.f32.partialorder %v428_v42, %v428_v42 }
 0x29c   :  { %s566_s9 = smov [#allocation4]  }
 0x29d   :  { %v360_v46 = vsub.f32 0.0, %v359_v45  ;;  %s394_s11 = sshll.u32 %s566_s9, 4  ;;  %s395_s11 = int_to_ptr.vmem [resolvable:$true] %s394_s11 }
 0x29e   :  { %s537_s12 = scalar_lea.vmem %s395_s11, 128  ;;  %p542_p9 = scmp.lt.s32.totalorder %s395_s11, %s395_s11 }
 0x29f   :  { %v361_v47 = vmul.f32 1.442695, %v360_v46  ;;  %p538_p8 = scmp.ne.s32.totalorder %s395_s11, %s537_s12  ;;  %p543_p10 = scmp.lt.s32.totalorder %s537_s12, %s537_s12 }
 0x2a1   :  { %509 = vpow2.f32 %v361_v47  ;;  %p544_p11 = por %p543_p10, %p542_p9 }
 0x2a3   :  { %p545_p12 = pnand %p544_p11, %p538_p8 }
 0x2ab   :  { %v510_v48 = vpop.eup %509 }
 0x2ac   :  { %v363_v49 = vadd.f32 1.0, %v510_v48  ;;  %v366_v50 = vmul.f32 -0.5, %v510_v48  ;;  %v369_v52 = vand.u32 2147483647, %v510_v48 }
 0x2ae   :  { %511 = vlog2.f32 %v363_v49  ;;  %v367_v51 = vadd.f32 1.0, %v366_v50  ;;  %vm370_vm4 = vcmp.lt.f32.partialorder %v369_v52, 0.0004427343 }
 0x2b0   :  { %v368_v55 = vmul.f32 %v510_v48, %v367_v51 }
 0x2b8   :  { %v512_v53 = vpop.eup %511 }
 0x2b9   :  { %v365_v54 = vmul.f32 0.6931472, %v512_v53 }
 0x2bb   :  { %v371_v57 = vsel %vm370_vm4, %v368_v55, %v365_v54 }
 0x2bc   :  { %v372_v58 = vadd.f32 %v371_v57, %v356_v56 }
 0x2be   :  { %v373_v59 = vsel %vm357_vm5, %v428_v42, %v372_v58 }
 0x2bf   :  { %513 = vlog2.f32 %v373_v59 }
 0x2c9   :  { %v514_v60 = vpop.eup %513 }
 0x2ca   :  { %v375_v61 = vmul.f32 0.6931472, %v514_v60 }
 0x2cc   :  { %v376_v62 = vmul.f32 2.0, %v375_v61 }
 0x2ce   :  { %377 = vst.msk [vmem:[#allocation4] sm:$0xff] %vm274_vm3, %v376_v62 }
 0x2cf   :  { %548 = shalt.err (!%p545_p12)
}
 0x2d0   :  { %s549_s14 = scalar_lea.hbm %s722_s10, 128 }
 0x2d1   :  { %p550_p13 = scmp.ne.s32.totalorder %s722_s10, %s549_s14  ;;  %p553_p0 = scmp.lt.u32.totalorder %s549_s14, %s722_s10 }
 0x2d3   :  { %p555_p1 = pnand %p553_p0, %p550_p13 }
 0x2d5   :  { %558 = shalt.err (!%p555_p1)
}
 0x2d6   :  { %397 = dma.vmem_to_hbm [thread:$0]  %s395_s11, 128, %s722_s10, [#allocation5]  }
 0x2d7   :  { %559 = dma.done.wait [#allocation3], 128  }
 0x2d8   :  { %560 = vsyncadd [#allocation3], 4294967168 }
 0x2d9   :  { %561 = dma.done.wait [#allocation5], 128  }
 0x2da   :  { %562 = vsyncadd [#allocation5], 4294967168 }
 0x2db   :  { %404 = vsyncpa [#allocation3], 1 }
 0x2dc   :  { %405 = vsyncpa [#allocation5], 1 }

</bundles_post_ra>
